<compile_context>
chip_gen: v6e
topology: v6e:2x2x1
jax: 0.10.0
libtpu: 0.0.40
codegen_flags: <defaults>
</compile_context>

<pallas_src>
import functools
import math

import jax
import jax.numpy as jnp
from jax.experimental import pallas as pl
from jax.experimental.pallas import tpu as pltpu


def _round_up(n, m):
    return ((n + m - 1) // m) * m


def _vmem_capacity_bytes():
    """Per-TensorCore VMEM capacity; conservative fallback if query fails."""
    try:
        cap = getattr(pltpu.get_tpu_info(), "vmem_capacity_bytes", None)
        if cap:
            return int(cap)
    except Exception:
        pass
    return 64 * 1024 * 1024  # v7x per-TC VMEM (smallest of v5e/v6e/v7x)


def _logvar_kernel(x_ref, s_ref, st_ref, o_ref, *, inv_t, inv_tm1, packed):
    # x_ref : (g_tile, L)   L = k*T, each row packs k contiguous length-T rows
    # s_ref : (L, k) 0/1 segment indicator, st_ref: (k, L) its transpose
    #         (dummy (1,1) arrays when packed == False)
    # o_ref : (g_tile, k)   log-variance per segment
    x = x_ref[...].astype(jnp.float32)  # f32 accumulation (required on v5e)
    if packed:
        s = s_ref[...]
        # Two-pass variance via segmented sums on the MXU. HIGHEST precision
        # keeps f32 accuracy; MXU passes are hidden behind the HBM DMA.
        seg_sum = jnp.dot(x, s, preferred_element_type=jnp.float32,
                          precision=jax.lax.Precision.HIGHEST)           # (g, k)
        mean = seg_sum * inv_t
        mean_exp = jnp.dot(mean, st_ref[...], preferred_element_type=jnp.float32,
                           precision=jax.lax.Precision.HIGHEST)          # (g, L)
        diff = x - mean_exp
        seg_sq = jnp.dot(diff * diff, s, preferred_element_type=jnp.float32,
                         precision=jax.lax.Precision.HIGHEST)            # (g, k)
    else:
        # Plain per-row reduction over the lane axis (T >= 128: lanes already
        # well utilised). Two-pass, exact f32.
        mean = jnp.sum(x, axis=-1, keepdims=True) * inv_t
        diff = x - mean
        seg_sq = jnp.sum(diff * diff, axis=-1, keepdims=True)
    var = jnp.clip(seg_sq * inv_tm1, 1e-6, 1e6)
    o_ref[...] = jnp.log(var).astype(o_ref.dtype)


def log_var_layer(x, dim):
    """Pallas implementation of LogVarLayer.forward (keepdim=True)."""
    ndim = x.ndim
    dim = dim % ndim

    # --- glue: reduction axis last, flatten others to rows -------------------
    perm = tuple(i for i in range(ndim) if i != dim) + (dim,)
    xt = jnp.transpose(x, perm)              # no-op when dim is already last
    lead_shape = xt.shape[:-1]
    t = xt.shape[-1]
    rows = int(math.prod(lead_shape)) if lead_shape else 1
    x2d = xt.reshape(rows, t)

    out_dtype = x.dtype if jnp.issubdtype(x.dtype, jnp.floating) else jnp.float32

    # --- lane packing for small T --------------------------------------------
    k = 1
    while k * t < 128 and k < 16:
        k *= 2
    packed = k > 1
    L = k * t

    # --- tile sizing from per-generation VMEM --------------------------------
    vmem_cap = _vmem_capacity_bytes()
    per_row_bytes = _round_up(L, 128) * 4          # f32 VMEM footprint per group-row
    g_needed = pl.cdiv(rows, k)
    # Budget ~1/12 of VMEM per input block: leaves room for double buffering
    # and the in-kernel f32 temporaries (x, mean_exp, diff*diff).
    max_gt = max(8, (vmem_cap // 12) // per_row_bytes)
    g_tile = min(max(g_needed, 8), max_gt, 4096)
    g_tile = max(8, (g_tile // 8) * 8)
    # Prefer >= 2 grid steps so v7x's two TensorCores both get work.
    if g_needed > 8 and pl.cdiv(g_needed, g_tile) < 2:
        g_tile = max(8, (_round_up(g_needed, 2) // 2) // 8 * 8)
    # Rebalance the tile so padding is at most ~one tile's worth of rows.
    num_blocks = pl.cdiv(g_needed, g_tile)
    g_tile = max(8, _round_up(pl.cdiv(g_needed, num_blocks), 8))
    g_pad = num_blocks * g_tile

    # Pad rows instead of falling back to one giant full-extent block.
    rows_pad = g_pad * k
    if rows_pad != rows:
        # Zero rows -> var 0 -> clamped to 1e-6 -> finite log; sliced off below.
        x2d = jnp.pad(x2d, ((0, rows_pad - rows), (0, 0)))
    x_packed = x2d.reshape(g_pad, L)               # free reshape (rows contiguous)

    # Segment indicator matrices (DMA'd once: constant block index).
    if packed:
        seg_ids = jnp.arange(L, dtype=jnp.int32) // t
        s_mat = (seg_ids[:, None] == jnp.arange(k, dtype=jnp.int32)[None, :]
                 ).astype(jnp.float32)             # (L, k)
        st_mat = jnp.transpose(s_mat)              # (k, L)
    else:
        s_mat = jnp.zeros((1, 1), jnp.float32)     # unused dummies
        st_mat = jnp.zeros((1, 1), jnp.float32)

    # --- VMEM limit: double-buffered blocks + f32 temporaries + headroom -----
    in_block_bytes = g_tile * per_row_bytes
    out_block_bytes = g_tile * _round_up(k, 128) * 4
    s_bytes = _round_up(s_mat.shape[0], 8) * _round_up(s_mat.shape[1], 128) * 4
    st_bytes = _round_up(st_mat.shape[0], 8) * _round_up(st_mat.shape[1], 128) * 4
    vmem_limit = 6 * in_block_bytes + 2 * out_block_bytes + 2 * (s_bytes + st_bytes)
    vmem_limit += 8 << 20
    vmem_limit = max(vmem_limit, 16 << 20)
    vmem_limit = min(vmem_limit, int(0.85 * vmem_cap))

    inv_t = 1.0 / float(t)
    # NOTE: t == 1 -> torch.var(correction=1) yields nan; we require t >= 2 and
    # guard the divide so no inf is generated for degenerate inputs.
    inv_tm1 = 1.0 / float(max(t - 1, 1))

    kernel = functools.partial(_logvar_kernel, inv_t=inv_t, inv_tm1=inv_tm1,
                               packed=packed)

    out = pl.pallas_call(
        kernel,
        out_shape=jax.ShapeDtypeStruct((g_pad, k), out_dtype),
        grid_spec=pltpu.PrefetchScalarGridSpec(
            num_scalar_prefetch=0,
            grid=(int(num_blocks),),
            in_specs=[
                pl.BlockSpec((g_tile, L), lambda i: (i, 0)),
                pl.BlockSpec(s_mat.shape, lambda i: (0, 0)),
                pl.BlockSpec(st_mat.shape, lambda i: (0, 0)),
            ],
            out_specs=pl.BlockSpec((g_tile, k), lambda i: (i, 0)),
        ),
        compiler_params=pltpu.CompilerParams(
            dimension_semantics=("parallel",),
            vmem_limit_bytes=int(vmem_limit),
        ),
    )(x_packed, s_mat, st_mat)

    # --- un-flatten, drop padding, restore axis order -------------------------
    out_rows = out.reshape(rows_pad)[:rows]
    out = out_rows.reshape(lead_shape + (1,))
    inv_perm = [0] * ndim
    for new_pos, old_pos in enumerate(perm):
        inv_perm[old_pos] = new_pos
    return jnp.transpose(out, inv_perm)


def _reference(x, dim):
    # Pure-JAX reference matching torch semantics (unbiased var, keepdim).
    var = jnp.var(x.astype(jnp.float32), axis=dim, keepdims=True, ddof=1)
    return jnp.log(jnp.clip(var, 1e-6, 1e6)).astype(x.dtype)


if __name__ == "__main__":
    key = jax.random.PRNGKey(0)
    # FBCNet uses LogVarLayer with dim=3 on (batch, channels, bands/stride, time).
    B, C, H, T = 2, 4, 16, 16
    x = jax.random.normal(key, (B, C, H, T), dtype=jnp.float32)

    y = jax.block_until_ready(log_var_layer(x, dim=3))
    y_ref = _reference(x, 3)
    assert y.shape == (B, C, H, 1), y.shape
    assert y.dtype == x.dtype, y.dtype
    assert jnp.allclose(y, y_ref, atol=1e-4, rtol=1e-4), (
        float(jnp.max(jnp.abs(y - y_ref))))

    # Also exercise the unpacked path (T >= 128) with a row count that does
    # not divide the tile (hits the zero-padding path).
    x2 = jax.random.normal(jax.random.PRNGKey(1), (3, 5, 7, 160), dtype=jnp.float32)
    y2 = jax.block_until_ready(log_var_layer(x2, dim=3))
    y2_ref = _reference(x2, 3)
    assert y2.shape == (3, 5, 7, 1), y2.shape
    assert jnp.allclose(y2, y2_ref, atol=1e-4, rtol=1e-4), (
        float(jnp.max(jnp.abs(y2 - y2_ref))))

    print("KERNEL_OK")
</pallas_src>

<mosaic_0001>
module attributes {stable_mosaic.version = 11 : i64} {
  func.func @_logvar_kernel(%arg0: i32, %arg1: memref<8x128xf32, #tpu.memory_space<vmem>>, %arg2: memref<128x8xf32, #tpu.memory_space<vmem>>, %arg3: memref<8x128xf32, #tpu.memory_space<vmem>>, %arg4: memref<8x8xf32, #tpu.memory_space<vmem>>) attributes {dimension_semantics = [#tpu.dimension_semantics<parallel>], iteration_bounds = array<i64: 2>, scalar_prefetch = 0 : i64, scratch_operands = 0 : i64, tpu.core_type = #tpu.core_type<tc>, window_params = [{transform_indices = @transform_0, window_bounds = array<i64: 8, 128>}, {pipeline_mode = #tpu.pipeline_mode<synchronous>, transform_indices = @transform_1, window_bounds = array<i64: 128, 8>}, {pipeline_mode = #tpu.pipeline_mode<synchronous>, transform_indices = @transform_2, window_bounds = array<i64: 8, 128>}, {transform_indices = @transform_3, window_bounds = array<i64: 8, 8>}]} {
    %c0 = arith.constant 0 : index
    %c0_0 = arith.constant 0 : index
    %0 = vector.load %arg1[%c0, %c0_0] : memref<8x128xf32, #tpu.memory_space<vmem>>, vector<8x128xf32>
    %c0_1 = arith.constant 0 : index
    %c0_2 = arith.constant 0 : index
    %1 = vector.load %arg2[%c0_1, %c0_2] : memref<128x8xf32, #tpu.memory_space<vmem>>, vector<128x8xf32>
    %cst = arith.constant dense<0.000000e+00> : vector<8x8xf32>
    %2 = tpu.matmul %0, %1, %cst {dimension_numbers = #tpu.dot_dimension_numbers<[1], [0], [0], [1], [0, 0, 1, 1], [], []>, precision = #tpu.contract_precision<fp32>} : vector<8x128xf32>, vector<128x8xf32>, vector<8x8xf32> -> vector<8x8xf32>
    %cst_3 = arith.constant 6.250000e-02 : f32
    %3 = vector.broadcast %cst_3 : f32 to vector<8x8xf32>
    %4 = arith.mulf %2, %3 : vector<8x8xf32>
    %c0_4 = arith.constant 0 : index
    %c0_5 = arith.constant 0 : index
    %5 = vector.load %arg3[%c0_4, %c0_5] : memref<8x128xf32, #tpu.memory_space<vmem>>, vector<8x128xf32>
    %cst_6 = arith.constant dense<0.000000e+00> : vector<8x128xf32>
    %6 = tpu.matmul %4, %5, %cst_6 {dimension_numbers = #tpu.dot_dimension_numbers<[1], [0], [0], [1], [0, 0, 1, 1], [], []>, precision = #tpu.contract_precision<fp32>} : vector<8x8xf32>, vector<8x128xf32>, vector<8x128xf32> -> vector<8x128xf32>
    %7 = arith.subf %0, %6 : vector<8x128xf32>
    %8 = arith.mulf %7, %7 : vector<8x128xf32>
    %cst_7 = arith.constant dense<0.000000e+00> : vector<8x8xf32>
    %9 = tpu.matmul %8, %1, %cst_7 {dimension_numbers = #tpu.dot_dimension_numbers<[1], [0], [0], [1], [0, 0, 1, 1], [], []>, precision = #tpu.contract_precision<fp32>} : vector<8x128xf32>, vector<128x8xf32>, vector<8x8xf32> -> vector<8x8xf32>
    %cst_8 = arith.constant 0.0666666701 : f32
    %10 = vector.broadcast %cst_8 : f32 to vector<8x8xf32>
    %11 = arith.mulf %9, %10 : vector<8x8xf32>
    %cst_9 = arith.constant 9.99999997E-7 : f32
    %cst_10 = arith.constant 1.000000e+06 : f32
    %12 = vector.broadcast %cst_9 : f32 to vector<8x8xf32>
    %13 = arith.maximumf %12, %11 : vector<8x8xf32>
    %14 = vector.broadcast %cst_10 : f32 to vector<8x8xf32>
    %15 = arith.minimumf %14, %13 : vector<8x8xf32>
    %16 = math.log %15 : vector<8x8xf32>
    %c0_11 = arith.constant 0 : index
    %c0_12 = arith.constant 0 : index
    %17 = vector.load %arg4[%c0_11, %c0_12] : memref<8x8xf32, #tpu.memory_space<vmem>>, vector<8x8xf32>
    tpu.vector_store %arg4[%c0_11, %c0_12], %16 {strides = array<i32>} : memref<8x8xf32, #tpu.memory_space<vmem>>, vector<8x8xf32>,
    return
  }
  func.func @transform_0(%arg0: i32) -> (i32, i32) {
    %c0_i32 = arith.constant 0 : i32
    %c0_i32_0 = arith.constant 0 : i32
    return %arg0, %c0_i32 : i32, i32
  }
  func.func @transform_1(%arg0: i32) -> (i32, i32) {
    %c0_i32 = arith.constant 0 : i32
    %c0_i32_0 = arith.constant 0 : i32
    %c0_i32_1 = arith.constant 0 : i32
    return %c0_i32, %c0_i32_0 : i32, i32
  }
  func.func @transform_2(%arg0: i32) -> (i32, i32) {
    %c0_i32 = arith.constant 0 : i32
    %c0_i32_0 = arith.constant 0 : i32
    %c0_i32_1 = arith.constant 0 : i32
    return %c0_i32, %c0_i32_0 : i32, i32
  }
  func.func @transform_3(%arg0: i32) -> (i32, i32) {
    %c0_i32 = arith.constant 0 : i32
    %c0_i32_0 = arith.constant 0 : i32
    return %arg0, %c0_i32 : i32, i32
  }
}

</mosaic_0001>

<bundles_post_ra>
// kernel: tpu_custom_call.1
= control target key start
LH: loop header
LB: loop body
LE: loop exit
PB: predicated region body
PF: predicated region fallthrough
CT: control target
= control target key end

     0   :  { %s2695_s12 = smov 0   ;;  %s3431_s0 = inlined_call_operand.vmem [shape: f32[16,128], index: 0, kind: input, shape index: {}]   ;;  %s3432_s1 = inlined_call_operand.vmem [shape: f32[128,8], index: 1, kind: input, shape index: {}]   ;;  %s3433_s2 = inlined_call_operand.vmem [shape: f32[8,128], index: 2, kind: input, shape index: {}]   ;;  %s3434_s3 = inlined_call_operand.vmem [shape: f32[16,8], index: 3, kind: output, shape index: {}]  }
   0x1 LB: > { %s1978_s13 = sadd.s32 4294967295, %s2671_s12   ;;  %p1982_p0 = scmp.ge.s32.totalorder %s2671_s12, 1  ;;  %s2671_s12 = sphi %s2695_s12, %s13_s12  }
   0x2   : > { %p136_p1 = scmp.lt.s32.totalorder %s2671_s12, 3 }
   0x4   : > { %p137_p2 = pnand %p1982_p0, %p136_p1 }
   0x6   : > { %140 = sbr.rel (%p137_p2) target bundleno = 834 (0x342), region = 32 }
   0xb   : > { %v182_v0 = vld [vmem:[%s3432_s1 + $0x78] sm:$0xff]  ;;  %v181_v1 = vld [vmem:[%s3432_s1 + $0x70] sm:$0xff]  ;;  %v180_v2 = vld [vmem:[%s3432_s1 + $0x68] sm:$0xff]  ;;  %p2714_p3 = scmp.lt.s32.totalorder %s1978_s13, 1  ;;  %v3458_v3 = vmov 0.0   ;;  %vm2674_vm0 = vmmov 0  }
   0xc   : > { %2203 = vmatprep.subr.mxu0 %v3458_v3  ;;  %v2719_v4 = vand.u32 4294901760, %v182_v0  ;;  %v2721_v5 = vand.u32 4294901760, %v181_v1  ;;  %v2723_v6 = vand.u32 4294901760, %v180_v2  ;;  %v179_v7 = vld [vmem:[%s3432_s1 + $0x60] sm:$0xff]  ;;  %2238 = vmatprep.subr.mxu1 %v3458_v3  ;;  %v178_v8 = vld [vmem:[%s3432_s1 + $0x58] sm:$0xff]  ;;  %v177_v9 = vld [vmem:[%s3432_s1 + $0x50] sm:$0xff] }
   0xd   : > { %v2735_v10 = vand.u32 4294901760, %v179_v7  ;;  %v2737_v11 = vand.u32 4294901760, %v178_v8  ;;  %v2739_v12 = vand.u32 4294901760, %v177_v9  ;;  %v176_v13 = vld [vmem:[%s3432_s1 + $0x48] sm:$0xff]  ;;  %v175_v14 = vld [vmem:[%s3432_s1 + $0x40] sm:$0xff]  ;;  %2235 = vmatprep.mubr.msk.f32.mxu0 %vm2674_vm0, %v3458_v3  ;;  %2270 = vmatprep.mubr.msk.f32.mxu1 %vm2674_vm0, %v3458_v3  ;;  %v174_v19 = vld [vmem:[%s3432_s1 + $0x38] sm:$0xff] }
   0xe   : > { %2204 = vmatpush3.msra.mxu0 %v2719_v4  ;;  %v2753_v15 = vsub.f32 %v182_v0, %v2719_v4  ;;  %v2756_v16 = vsub.f32 %v181_v1, %v2721_v5  ;;  %v2758_v17 = vand.u32 4294901760, %v176_v13  ;;  %v2761_v18 = vsub.f32 %v180_v2, %v2723_v6  ;;  %s3514_s13 = smov (!%p2714_p3, %s1978_s13), 1  ;;  %v173_v26 = vld [vmem:[%s3432_s1 + $0x30] sm:$0xff]  ;;  %v172_v36 = vld [vmem:[%s3432_s1 + $0x28] sm:$0xff]  ;;  %v171_v41 = vld [vmem:[%s3432_s1 + $0x20] sm:$0xff] }
   0xf   : > { %2205 = vmatprep.subr.mxu0 %v3458_v3  ;;  %v2774_v20 = vsub.f32 %v179_v7, %v2735_v10  ;;  %v2777_v21 = vsub.f32 %v178_v8, %v2737_v11  ;;  %v2789_v25 = vand.u32 4294901760, %v175_v14  ;;  %v2798_v28 = vand.u32 4294901760, %v174_v19  ;;  %s1983_s8 = sshll.u32 %s3514_s13, 3  ;;  %v170_v49 = vld [vmem:[%s3432_s1 + $0x18] sm:$0xff]  ;;  %v169_v54 = vld [vmem:[%s3432_s1 + $0x10] sm:$0xff]  ;;  %v168_v60 = vld [vmem:[%s3432_s1 + $0x8] sm:$0xff] }
  0x10   : > { %2206 = vmatpush3.msra.mxu0 %v2721_v5  ;;  %v2781_v22 = vand.u32 4294901760, %v2753_v15  ;;  %v2784_v23 = vand.u32 4294901760, %v2756_v16  ;;  %v2787_v24 = vand.u32 4294901760, %v2761_v18  ;;  %v2804_v30 = vsub.f32 %v177_v9, %v2739_v12  ;;  %s161_s17 = scalar_lea.vmem %s3431_s0, %s1983_s8  ;;  %v167_v7 = vld [vmem:[%s3432_s1] sm:$0xff]  ;;  %s165_s30 = scalar_lea.vmem %s3434_s3, %s1983_s8 }
  0x11   : > { %2207 = vmatprep.subr.mxu0 %v3458_v3  ;;  %v2796_v27 = vand.u32 4294901760, %v2774_v20  ;;  %v2801_v29 = vand.u32 4294901760, %v2777_v21  ;;  %v2815_v34 = vsub.f32 %v176_v13, %v2758_v17  ;;  %v2818_v35 = vand.u32 4294901760, %v173_v26  ;;  %v2866_v50 = vld [vmem:[%s161_s17] sm:$0xff] }
  0x12   : > { %3462 = vst [vmem:[#allocation2_spill] sm:$0xff] %v2781_v22  ;;  %3463 = vst [vmem:[#allocation3_spill] sm:$0xff] %v2784_v23  ;;  %2208 = vmatpush3.msra.mxu0 %v2723_v6  ;;  %v278_v31 = vsub.f32 %v2753_v15, %v2781_v22  ;;  %v285_v32 = vsub.f32 %v2756_v16, %v2784_v23  ;;  %v292_v33 = vsub.f32 %v2761_v18, %v2787_v24  ;;  %vm826_vm1 = vcmask 64512  }
  0x13   : > { %3464 = vst [vmem:[#allocation4_spill] sm:$0xff] %v2787_v24  ;;  %3465 = vst [vmem:[#allocation5_spill] sm:$0xff] %v2796_v27  ;;  %2209 = vmatprep.subr.mxu0 %v3458_v3  ;;  %v299_v39 = vsub.f32 %v2774_v20, %v2796_v27  ;;  %v2831_v40 = vand.u32 4294901760, %v2804_v30  ;;  %v306_v42 = vsub.f32 %v2777_v21, %v2801_v29  ;;  %v2851_v45 = vand.u32 4294901760, %v172_v36 }
  0x14   : > { %3466 = vst [vmem:[#allocation6_spill] sm:$0xff] %v2801_v29  ;;  %2210 = vmatpush3.msra.mxu0 %v2735_v10  ;;  %v2824_v37 = vand.u32 4294901760, %v278_v31  ;;  %v2826_v38 = vand.u32 4294901760, %v285_v32  ;;  %v2845_v43 = vsub.f32 %v175_v14, %v2789_v25  ;;  %v2849_v44 = vand.u32 4294901760, %v292_v33  ;;  %3469 = vst [vmem:[#allocation9_spill] sm:$0xff] %v2866_v50 }
  0x15   : > { %3467 = vst [vmem:[#allocation7_spill] sm:$0xff] %v2831_v40  ;;  %2211 = vmatprep.subr.mxu0 %v3458_v3  ;;  %v2854_v46 = vand.u32 4294901760, %v2815_v34  ;;  %v2857_v47 = vsub.f32 %v174_v19, %v2798_v28  ;;  %v2861_v48 = vand.u32 4294901760, %v171_v41  ;;  %v2870_v51 = vand.u32 4294901760, %v299_v39 }
  0x16   : > { %2212 = vmatpush3.msra.mxu0 %v2737_v11  ;;  %2239 = vmatpush3.msra.mxu1 %v2824_v37  ;;  %v313_v52 = vsub.f32 %v2804_v30, %v2831_v40  ;;  %v2875_v53 = vand.u32 4294901760, %v2845_v43  ;;  %v2881_v55 = vsub.f32 %v173_v26, %v2818_v35  ;;  %v2885_v56 = vand.u32 4294901760, %v306_v42 }
  0x17   : > { %3468 = vst [vmem:[#allocation8_spill] sm:$0xff] %v2854_v46  ;;  %2213 = vmatprep.subr.mxu0 %v3458_v3  ;;  %2240 = vmatprep.subr.mxu1 %v3458_v3  ;;  %3470 = vst [vmem:[#allocation10_spill] sm:$0xff] %v2870_v51  ;;  %v2888_v57 = vand.u32 4294901760, %v2857_v47  ;;  %v320_v58 = vsub.f32 %v2815_v34, %v2854_v46  ;;  %v2894_v59 = vand.u32 4294901760, %v170_v49  ;;  %v2903_v62 = vand.u32 4294901760, %v2866_v50 }
  0x18   : > { %2214 = vmatpush3.msra.mxu0 %v2739_v12  ;;  %2241 = vmatpush3.msra.mxu1 %v2826_v38  ;;  %3471 = vst [vmem:[#allocation11_spill] sm:$0xff] %v2875_v53  ;;  %3472 = vst [vmem:[#allocation12_spill] sm:$0xff] %v2885_v56  ;;  %v2900_v61 = vsub.f32 %v172_v36, %v2851_v45  ;;  %v2907_v63 = vand.u32 4294901760, %v169_v54  ;;  %v2911_v0 = vand.u32 4294901760, %v313_v52  ;;  %v2916_v2 = vand.u32 4294901760, %v2881_v55 }
  0x19   : > { %2215 = vmatprep.subr.mxu0 %v3458_v3  ;;  %2242 = vmatprep.subr.mxu1 %v3458_v3  ;;  %3473 = vst [vmem:[#allocation13_spill] sm:$0xff] %v2888_v57  ;;  %v327_v1 = vsub.f32 %v2845_v43, %v2875_v53  ;;  %v2922_v8 = vsub.f32 %v171_v41, %v2861_v48  ;;  %v2928_v13 = vand.u32 4294901760, %v168_v60  ;;  %v2932_v14 = vand.u32 4294901760, %v320_v58 }
  0x1a   : > { %2216 = vmatpush3.msra.mxu0 %v2758_v17  ;;  %2243 = vmatpush3.msra.mxu1 %v2849_v44  ;;  %3474 = vst [vmem:[#allocation14_spill] sm:$0xff] %v2911_v0  ;;  %3475 = vst [vmem:[#allocation15_spill] sm:$0xff] %v2916_v2  ;;  %v334_v9 = vsub.f32 %v2857_v47, %v2888_v57  ;;  %v2935_v19 = vand.u32 4294901760, %v2900_v61  ;;  %v2939_v26 = vsub.f32 %v2866_v50, %v2903_v62 }
  0x1b   : > { %2217 = vmatprep.subr.mxu0 %v3458_v3  ;;  %2244 = vmatprep.subr.mxu1 %v3458_v3  ;;  %3476 = vst [vmem:[#allocation16_spill] sm:$0xff] %v2932_v14  ;;  %v2942_v31 = vsub.f32 %v170_v49, %v2894_v59  ;;  %v2946_v32 = vand.u32 4294901760, %v167_v7  ;;  %v2950_v33 = vand.u32 4294901760, %v327_v1  ;;  %v341_v36 = vsub.f32 %v2881_v55, %v2916_v2 }
  0x1c   : > { %2218 = vmatpush3.msra.mxu0 %v2789_v25  ;;  %2245 = vmatpush3.msra.mxu1 %v2870_v51  ;;  %3477 = vst [vmem:[#allocation17_spill] sm:$0xff] %v2935_v19  ;;  %v2955_v39 = vand.u32 4294901760, %v2922_v8  ;;  %v2958_v41 = vsub.f32 %v169_v54, %v2907_v63  ;;  %v2962_v42 = vand.u32 4294901760, %v334_v9  ;;  %v348_v49 = vsub.f32 %v2900_v61, %v2935_v19 }
  0x1d   : > { %2219 = vmatprep.subr.mxu0 %v3458_v3  ;;  %2246 = vmatprep.subr.mxu1 %v3458_v3  ;;  %3478 = vst [vmem:[#allocation18_spill] sm:$0xff] %v2950_v33  ;;  %v2970_v58 = vand.u32 4294901760, %v2942_v31  ;;  %v2973_v54 = vsub.f32 %v168_v60, %v2928_v13  ;;  %v2979_v1 = vand.u32 4294901760, %v341_v36  ;;  %v2987_v50 = vsub.f32 %v167_v7, %v2946_v32 }
  0x1e   : > { %2220 = vmatpush3.msra.mxu0 %v2798_v28  ;;  %2247 = vmatpush3.msra.mxu1 %v2885_v56  ;;  %3479 = vst [vmem:[#allocation19_spill] sm:$0xff] %v2955_v39  ;;  %3480 = vst [vmem:[#allocation20_spill] sm:$0xff] %v2962_v42  ;;  %v355_v9 = vsub.f32 %v2922_v8, %v2955_v39  ;;  %v2984_v52 = vand.u32 4294901760, %v2958_v41  ;;  %v2993_v60 = vand.u32 4294901760, %v348_v49  ;;  %v3484_v36 = vand.u32 4294901760, %v2939_v26 }
  0x1f   : > { %2221 = vmatprep.subr.mxu0 %v3458_v3  ;;  %2248 = vmatprep.subr.mxu1 %v3458_v3  ;;  %3481 = vst [vmem:[#allocation21_spill] sm:$0xff] %v2970_v58  ;;  %3482 = vst [vmem:[#allocation22_spill] sm:$0xff] %v2979_v1  ;;  %v3001_v7 = vand.u32 4294901760, %v2973_v54 }
  0x20   : > { %2222 = vmatpush3.msra.mxu0 %v2818_v35  ;;  %2249 = vmatpush3.msra.mxu1 %v2911_v0  ;;  %3483 = vst [vmem:[#allocation23_spill] sm:$0xff] %v2984_v52  ;;  %v3007_v49 = vand.u32 4294901760, %v355_v9 }
  0x21   : > { %2223 = vmatprep.subr.mxu0 %v3458_v3  ;;  %2250 = vmatprep.subr.mxu1 %v3458_v3  ;;  %3485 = vst [vmem:[#allocation24_spill] sm:$0xff] %v3001_v7  ;;  %v376_v9 = vsub.f32 %v2973_v54, %v3001_v7 }
  0x22   : > { %2224 = vmatpush3.msra.mxu0 %v2851_v45  ;;  %2251 = vmatpush3.msra.mxu1 %v2932_v14  ;;  %v362_v14 = vsub.f32 %v2942_v31, %v2970_v58 }
  0x23   : > { %2225 = vmatprep.subr.mxu0 %v3458_v3  ;;  %2252 = vmatprep.subr.mxu1 %v3458_v3 }
  0x24   : > { %2226 = vmatpush3.msra.mxu0 %v2861_v48  ;;  %2253 = vmatpush3.msra.mxu1 %v2950_v33  ;;  %v267_v33 = vsub.f32 %v2939_v26, %v3484_v36  ;;  %v3012_v36 = vand.u32 4294901760, %v2987_v50  ;;  %v3018_v56 = vand.u32 4294901760, %v362_v14  ;;  %v3033_v14 = vand.u32 4294901760, %v376_v9 }
  0x25   : > { %2227 = vmatprep.subr.mxu0 %v3458_v3  ;;  %2254 = vmatprep.subr.mxu1 %v3458_v3 }
  0x26   : > { %2228 = vmatpush3.msra.mxu0 %v2894_v59  ;;  %2255 = vmatpush3.msra.mxu1 %v2962_v42  ;;  %v369_v42 = vsub.f32 %v2958_v41, %v2984_v52  ;;  %3486 = vst [vmem:[#allocation25_spill] sm:$0xff] %v3012_v36  ;;  %v268_v0 = vand.u32 4294901760, %v267_v33  ;;  %v383_v51 = vsub.f32 %v2987_v50, %v3012_v36 }
  0x27   : > { %2229 = vmatprep.subr.mxu0 %v3458_v3  ;;  %2256 = vmatprep.subr.mxu1 %v3458_v3 }
  0x28   : > { %2230 = vmatpush3.msra.mxu0 %v2907_v63  ;;  %2257 = vmatpush3.msra.mxu1 %v2979_v1  ;;  %v3026_v1 = vand.u32 4294901760, %v369_v42  ;;  %v3039_v33 = vand.u32 4294901760, %v383_v51  ;;  %v3487_v51 = vand.u32 4294901760, %v2939_v26 }
  0x29   : > { %2231 = vmatprep.subr.mxu0 %v3458_v3  ;;  %2258 = vmatprep.subr.mxu1 %v3458_v3 }
  0x2a   : > { %2232 = vmatpush3.msra.mxu0 %v2928_v13  ;;  %2259 = vmatpush3.msra.mxu1 %v2993_v60 }
  0x2b   : > { %2233 = vmatprep.subr.mxu0 %v3458_v3  ;;  %2260 = vmatprep.subr.mxu1 %v3458_v3 }
  0x2c   : > { %2234 = vmatpush3.msra.mxu0 %v2946_v32  ;;  %2261 = vmatpush3.msra.mxu1 %v3007_v49 }
  0x2d   : > { %2262 = vmatprep.subr.mxu1 %v3458_v3  ;;  %2273 = vmatprep.subr.mxu0 %v3458_v3 }
  0x2e   : > { %2236 = vmatmul.mubr.f32.vlgmr.msra.gmra.mxu0 %v268_v0  ;;  %2263 = vmatpush3.msra.mxu1 %v3018_v56  ;;  %v825_v0 = vld [vmem:[%s3433_s2] sm:$0xff] }
  0x2f   : > { %2274 = vmatpush3.msra.mxu0 %v2753_v15  ;;  %2264 = vmatprep.subr.mxu1 %v3458_v3 }
  0x30   : > { %2275 = vmatprep.subr.mxu0 %v3458_v3  ;;  %2265 = vmatpush3.msra.mxu1 %v3026_v1 }
  0x31   : > { %2276 = vmatpush3.msra.mxu0 %v2756_v16  ;;  %2266 = vmatprep.subr.mxu1 %v3458_v3 }
  0x32   : > { %2277 = vmatprep.subr.mxu0 %v3458_v3  ;;  %2267 = vmatpush3.msra.mxu1 %v3033_v14 }
  0x33   : > { %2278 = vmatpush3.msra.mxu0 %v2761_v18  ;;  %2268 = vmatprep.subr.mxu1 %v3458_v3 }
  0x34   : > { %2279 = vmatprep.subr.mxu0 %v3458_v3  ;;  %2269 = vmatpush3.msra.mxu1 %v3039_v33 }
  0x35   : > { %2280 = vmatpush3.msra.mxu0 %v2774_v20  ;;  %2271 = vmatmul.mubr.f32.vlgmr.msra.gmra.mxu1 %v2903_v62 }
  0x36   : > { %2281 = vmatprep.subr.mxu0 %v3458_v3  ;;  %2308 = vmatprep.subr.mxu1 %v3458_v3 }
  0x37   : > { %2282 = vmatpush3.msra.mxu0 %v2777_v21  ;;  %2309 = vmatpush3.msra.mxu1 %v2719_v4 }
  0x38   : > { %2283 = vmatprep.subr.mxu0 %v3458_v3  ;;  %2310 = vmatprep.subr.mxu1 %v3458_v3 }
  0x39   : > { %2284 = vmatpush3.msra.mxu0 %v2804_v30  ;;  %2311 = vmatpush3.msra.mxu1 %v2721_v5 }
  0x3a   : > { %2285 = vmatprep.subr.mxu0 %v3458_v3  ;;  %2312 = vmatprep.subr.mxu1 %v3458_v3 }
  0x3b   : > { %2286 = vmatpush3.msra.mxu0 %v2815_v34  ;;  %2313 = vmatpush3.msra.mxu1 %v2723_v6 }
  0x3c   : > { %2287 = vmatprep.subr.mxu0 %v3458_v3  ;;  %2314 = vmatprep.subr.mxu1 %v3458_v3 }
  0x3d   : > { %2288 = vmatpush3.msra.mxu0 %v2845_v43  ;;  %2315 = vmatpush3.msra.mxu1 %v2735_v10 }
  0x3e   : > { %2289 = vmatprep.subr.mxu0 %v3458_v3  ;;  %2316 = vmatprep.subr.mxu1 %v3458_v3 }
  0x3f   : > { %2290 = vmatpush3.msra.mxu0 %v2857_v47  ;;  %2317 = vmatpush3.msra.mxu1 %v2737_v11 }
  0x40   : > { %2291 = vmatprep.subr.mxu0 %v3458_v3  ;;  %2318 = vmatprep.subr.mxu1 %v3458_v3 }
  0x41   : > { %2292 = vmatpush3.msra.mxu0 %v2881_v55  ;;  %2319 = vmatpush3.msra.mxu1 %v2739_v12 }
  0x42   : > { %2293 = vmatprep.subr.mxu0 %v3458_v3  ;;  %2320 = vmatprep.subr.mxu1 %v3458_v3 }
  0x43   : > { %2294 = vmatpush3.msra.mxu0 %v2900_v61  ;;  %2321 = vmatpush3.msra.mxu1 %v2758_v17 }
  0x44   : > { %2295 = vmatprep.subr.mxu0 %v3458_v3  ;;  %2322 = vmatprep.subr.mxu1 %v3458_v3 }
  0x45   : > { %2296 = vmatpush3.msra.mxu0 %v2922_v8  ;;  %2323 = vmatpush3.msra.mxu1 %v2789_v25 }
  0x46   : > { %2297 = vmatprep.subr.mxu0 %v3458_v3  ;;  %2324 = vmatprep.subr.mxu1 %v3458_v3 }
  0x47   : > { %2298 = vmatpush3.msra.mxu0 %v2942_v31  ;;  %2325 = vmatpush3.msra.mxu1 %v2798_v28 }
  0x48   : > { %2299 = vmatprep.subr.mxu0 %v3458_v3  ;;  %2326 = vmatprep.subr.mxu1 %v3458_v3 }
  0x49   : > { %2300 = vmatpush3.msra.mxu0 %v2958_v41  ;;  %2327 = vmatpush3.msra.mxu1 %v2818_v35 }
  0x4a   : > { %2301 = vmatprep.subr.mxu0 %v3458_v3  ;;  %2328 = vmatprep.subr.mxu1 %v3458_v3 }
  0x4b   : > { %2302 = vmatpush3.msra.mxu0 %v2973_v54  ;;  %2329 = vmatpush3.msra.mxu1 %v2851_v45 }
  0x4c   : > { %2303 = vmatprep.subr.mxu0 %v3458_v3  ;;  %2330 = vmatprep.subr.mxu1 %v3458_v3 }
  0x4d   : > { %2304 = vmatpush3.msra.mxu0 %v2987_v50  ;;  %2305 = vmatprep.mubr.msk.f32.mxu0 %vm2674_vm0, %v3458_v3 }
  0x4e   : > { %2331 = vmatpush3.msra.mxu1 %v2861_v48  ;;  %2306 = vmatmul.mubr.f32.vlgmr.msra.gmra.mxu0 %v2939_v26  ;;  %v861_v26 = vand.u32 4294901760, %v825_v0 }
  0x4f   : > { %2332 = vmatprep.subr.mxu1 %v3458_v3  ;;  %2343 = vmatprep.subr.mxu0 %v3458_v3 }
  0x50   : > { %2333 = vmatpush3.msra.mxu1 %v2894_v59  ;;  %2344 = vmatpush3.msra.mxu0 %v2781_v22  ;;  %v938_v42 = vsub.f32 %v825_v0, %v861_v26 }
  0x51   : > { %2334 = vmatprep.subr.mxu1 %v3458_v3  ;;  %2345 = vmatprep.subr.mxu0 %v3458_v3 }
  0x52   : > { %2335 = vmatpush3.msra.mxu1 %v2907_v63  ;;  %2346 = vmatpush3.msra.mxu0 %v2784_v23  ;;  %v939_v9 = vand.u32 4294901760, %v938_v42 }
  0x53   : > { %2336 = vmatprep.subr.mxu1 %v3458_v3  ;;  %2347 = vmatprep.subr.mxu0 %v3458_v3 }
  0x54   : > { %2337 = vmatpush3.msra.mxu1 %v2928_v13  ;;  %2348 = vmatpush3.msra.mxu0 %v2787_v24 }
  0x55   : > { %2338 = vmatprep.subr.mxu1 %v3458_v3  ;;  %2349 = vmatprep.subr.mxu0 %v3458_v3 }
  0x56   : > { %2339 = vmatpush3.msra.mxu1 %v2946_v32  ;;  %2340 = vmatprep.mubr.msk.f32.mxu1 %vm2674_vm0, %v3458_v3 }
  0x57   : > { %2350 = vmatpush3.msra.mxu0 %v2796_v27  ;;  %2341 = vmatmul.mubr.f32.vlgmr.msra.gmra.mxu1 %v3487_v51  ;;  %v940_v51 = vsub.f32 %v938_v42, %v939_v9 }
  0x58   : > { %2351 = vmatprep.subr.mxu0 %v3458_v3  ;;  %2378 = vmatprep.subr.mxu1 %v3458_v3 }
  0x59   : > { %2352 = vmatpush3.msra.mxu0 %v2801_v29  ;;  %2379 = vmatpush3.msra.mxu1 %v2719_v4 }
  0x5a   : > { %2353 = vmatprep.subr.mxu0 %v3458_v3  ;;  %2380 = vmatprep.subr.mxu1 %v3458_v3 }
  0x5b   : > { %2354 = vmatpush3.msra.mxu0 %v2831_v40  ;;  %2381 = vmatpush3.msra.mxu1 %v2721_v5 }
  0x5c   : > { %2355 = vmatprep.subr.mxu0 %v3458_v3  ;;  %2382 = vmatprep.subr.mxu1 %v3458_v3 }
  0x5d   : > { %2356 = vmatpush3.msra.mxu0 %v2854_v46  ;;  %2383 = vmatpush3.msra.mxu1 %v2723_v6 }
  0x5e   : > { %2357 = vmatprep.subr.mxu0 %v3458_v3  ;;  %2384 = vmatprep.subr.mxu1 %v3458_v3 }
  0x5f   : > { %2358 = vmatpush3.msra.mxu0 %v2875_v53  ;;  %2385 = vmatpush3.msra.mxu1 %v2735_v10 }
  0x60   : > { %2359 = vmatprep.subr.mxu0 %v3458_v3  ;;  %2386 = vmatprep.subr.mxu1 %v3458_v3 }
  0x61   : > { %2360 = vmatpush3.msra.mxu0 %v2888_v57  ;;  %2387 = vmatpush3.msra.mxu1 %v2737_v11 }
  0x62   : > { %2361 = vmatprep.subr.mxu0 %v3458_v3  ;;  %2388 = vmatprep.subr.mxu1 %v3458_v3 }
  0x63   : > { %2362 = vmatpush3.msra.mxu0 %v2916_v2  ;;  %2389 = vmatpush3.msra.mxu1 %v2739_v12 }
  0x64   : > { %2363 = vmatprep.subr.mxu0 %v3458_v3  ;;  %2390 = vmatprep.subr.mxu1 %v3458_v3 }
  0x65   : > { %2364 = vmatpush3.msra.mxu0 %v2935_v19  ;;  %2391 = vmatpush3.msra.mxu1 %v2758_v17 }
  0x66   : > { %2365 = vmatprep.subr.mxu0 %v3458_v3  ;;  %2392 = vmatprep.subr.mxu1 %v3458_v3 }
  0x67   : > { %2366 = vmatpush3.msra.mxu0 %v2955_v39  ;;  %2393 = vmatpush3.msra.mxu1 %v2789_v25 }
  0x68   : > { %2367 = vmatprep.subr.mxu0 %v3458_v3  ;;  %2394 = vmatprep.subr.mxu1 %v3458_v3 }
  0x69   : > { %2368 = vmatpush3.msra.mxu0 %v2970_v58  ;;  %2395 = vmatpush3.msra.mxu1 %v2798_v28 }
  0x6a   : > { %2369 = vmatprep.subr.mxu0 %v3458_v3  ;;  %2396 = vmatprep.subr.mxu1 %v3458_v3 }
  0x6b   : > { %2370 = vmatpush3.msra.mxu0 %v2984_v52  ;;  %2397 = vmatpush3.msra.mxu1 %v2818_v35 }
  0x6c   : > { %2371 = vmatprep.subr.mxu0 %v3458_v3  ;;  %2398 = vmatprep.subr.mxu1 %v3458_v3 }
  0x6d   : > { %2372 = vmatpush3.msra.mxu0 %v3001_v7  ;;  %2399 = vmatpush3.msra.mxu1 %v2851_v45 }
  0x6e   : > { %2373 = vmatprep.subr.mxu0 %v3458_v3  ;;  %2400 = vmatprep.subr.mxu1 %v3458_v3 }
  0x6f   : > { %2374 = vmatpush3.msra.mxu0 %v3012_v36  ;;  %2375 = vmatprep.mubr.msk.f32.mxu0 %vm2674_vm0, %v3458_v3  ;;  %v941_v36 = vand.u32 4294901760, %v940_v51 }
  0x70   : > { %2401 = vmatpush3.msra.mxu1 %v2861_v48  ;;  %2376 = vmatmul.mubr.f32.vlgmr.msra.gmra.mxu0 %v2903_v62 }
  0x71   : > { %2402 = vmatprep.subr.mxu1 %v3458_v3  ;;  %2410 = vmatprep.mubr.msk.f32.mxu1 %vm2674_vm0, %v3458_v3 }
  0x72   : > { %2403 = vmatpush3.msra.mxu1 %v2894_v59  ;;  %2413 = vmatprep.subr.mxu0 %v3458_v3 }
  0x73   : > { %2404 = vmatprep.subr.mxu1 %v3458_v3  ;;  %2415 = vmatprep.mubr.msk.f32.mxu0 %vm2674_vm0, %v3458_v3 }
  0x74   : > { %2405 = vmatpush3.msra.mxu1 %v2907_v63  ;;  %2414 = vmatpush3.msra.mxu0 %v861_v26 }
  0x75   : > { %2406 = vmatprep.subr.mxu1 %v3458_v3  ;;  %2423 = vmatprep.subr.mxu0 %v3458_v3 }
  0x76   : > { %2407 = vmatpush3.msra.mxu1 %v2928_v13 }
  0x77   : > { %2408 = vmatprep.subr.mxu1 %v3458_v3 }
  0x78   : > { %2409 = vmatpush3.msra.mxu1 %v2946_v32 }
  0x79   : > { %2411 = vmatmul.mubr.f32.vlgmr.msra.gmra.mxu1 %v2903_v62  ;;  %2418 = vmatprep.subr.mxu1 %v3458_v3 }
  0x7a   : > { %2420 = vmatprep.mubr.msk.f32.mxu1 %vm2674_vm0, %v3458_v3  ;;  %2419 = vmatpush3.msra.mxu1 %v941_v36 }
  0x7b   : > { %2428 = vmatprep.subr.mxu1 %v3458_v3 }
  0xee   : > { %v270_v62 = vpop.f32.mrf.mxu0 }
  0xf0   : > { %v2237_v7 = vpop.f32.mrf.mxu0 }
  0xf5   : > { %v421_v52 = vpop.f32.mrf.mxu1 }
  0xf6   : > { %v422_v46 = vadd.f32 %v421_v52, %v270_v62 }
  0xf7   : > { %v2272_v58 = vpop.f32.mrf.mxu1 }
 0x10e   : > { %v525_v39 = vpop.f32.mrf.mxu0 }
 0x10f   : > { %v526_v40 = vadd.f32 %v525_v39, %v422_v46 }
 0x110   : > { %v2307_v19 = vpop.f32.mrf.mxu0 }
 0x111   : > { %v3488_v19 = vmov 0.0  }
 0x117   : > { %v614_v2 = vpop.f32.mrf.mxu1 }
 0x118   : > { %v615_v29 = vadd.f32 %v614_v2, %v526_v40 }
 0x119   : > { %v2342_v57 = vpop.f32.mrf.mxu1 }
 0x130   : > { %v733_v53 = vpop.f32.mrf.mxu0 }
 0x131   : > { %v734_v27 = vadd.f32 %v733_v53, %v615_v29  ;;  %v3493_v29 = vld [vmem:[#allocation18_spill] sm:$0xff] }
 0x132   : > { %v2377_v0 = vpop.f32.mrf.mxu0 }
 0x133   : > { %v3496_v0 = vld [vmem:[#allocation9_spill] sm:$0xff] }
 0x139   : > { %v820_v24 = vpop.f32.mrf.mxu1 }
 0x13a   : > { %v821_v23 = vadd.f32 %v820_v24, %v734_v27  ;;  %v3492_v27 = vld [vmem:[#allocation16_spill] sm:$0xff] }
 0x13b   : > { %v2412_v36 = vpop.f32.mrf.mxu1 }
 0x13c   : > { %v824_v51 = vmul.f32 0.0625, %v821_v23  ;;  %v3491_v23 = vld [vmem:[#allocation14_spill] sm:$0xff] }
 0x13e   : > { %v828_v3 = vsel %vm826_vm1, %v824_v51, 0 }
 0x13f   : > { %v896_v7 = vand.u32 4294901760, %v828_v3 }
 0x141   : > { %v897_v22 = vsub.f32 %v828_v3, %v896_v7  ;;  %2421 = vmatmul.mubr.f32.vlgmr.msra.gmra.mxu1 %v896_v7  ;;  %v3489_v3 = vld [vmem:[#allocation10_spill] sm:$0xff] }
 0x142   : > { %2429 = vmatpush3.msra.mxu1 %v861_v26  ;;  %2430 = vmatprep.mubr.msk.f32.mxu1 %vm2674_vm0, %v3488_v19 }
 0x143   : > { %v898_v57 = vand.u32 4294901760, %v897_v22  ;;  %2438 = vmatprep.subr.mxu1 %v3488_v19 }
 0x145   : > { %2431 = vmatmul.mubr.f32.vlgmr.msra.gmra.mxu1 %v898_v57  ;;  %v899_v40 = vsub.f32 %v897_v22, %v898_v57 }
 0x146   : > { %2439 = vmatpush3.msra.mxu1 %v861_v26  ;;  %2440 = vmatprep.mubr.msk.f32.mxu1 %vm2674_vm0, %v3488_v19 }
 0x147   : > { %v900_v24 = vand.u32 4294901760, %v899_v40  ;;  %2478 = vmatprep.subr.mxu1 %v3488_v19 }
 0x149   : > { %2416 = vmatmul.mubr.f32.vlgmr.msra.gmra.mxu0 %v900_v24  ;;  %2441 = vmatmul.mubr.f32.vlgmr.msra.gmra.mxu1 %v896_v7 }
 0x14a   : > { %2424 = vmatpush3.msra.mxu0 %v938_v42  ;;  %2425 = vmatprep.mubr.msk.f32.mxu0 %vm2674_vm0, %v3488_v19 }
 0x14b   : > { %2433 = vmatprep.subr.mxu0 %v3488_v19  ;;  %2479 = vmatpush3.msra.mxu1 %v2824_v37  ;;  %v3494_v37 = vld [vmem:[#allocation20_spill] sm:$0xff] }
 0x14c   : > { %2480 = vmatprep.subr.mxu1 %v3488_v19  ;;  %2510 = vmatprep.mubr.msk.f32.mxu1 %vm2674_vm0, %v3488_v19 }
 0x14d   : > { %2426 = vmatmul.mubr.f32.vlgmr.msra.gmra.mxu0 %v897_v22  ;;  %2481 = vmatpush3.msra.mxu1 %v2826_v38  ;;  %v3490_v22 = vld [vmem:[#allocation12_spill] sm:$0xff]  ;;  %v3495_v38 = vld [vmem:[#allocation22_spill] sm:$0xff] }
 0x14e   : > { %2434 = vmatpush3.msra.mxu0 %v939_v9  ;;  %2435 = vmatprep.mubr.msk.f32.mxu0 %vm2674_vm0, %v3488_v19 }
 0x14f   : > { %2482 = vmatprep.subr.mxu1 %v3488_v19  ;;  %2443 = vmatprep.subr.mxu0 %v3488_v19 }
 0x150   : > { %2483 = vmatpush3.msra.mxu1 %v2849_v44 }
 0x151   : > { %2436 = vmatmul.mubr.f32.vlgmr.msra.gmra.mxu0 %v896_v7  ;;  %2484 = vmatprep.subr.mxu1 %v3488_v19 }
 0x152   : > { %2485 = vmatpush3.msra.mxu1 %v3489_v3  ;;  %2444 = vmatpush3.msra.mxu0 %v2719_v4 }
 0x153   : > { %2486 = vmatprep.subr.mxu1 %v3488_v19  ;;  %2445 = vmatprep.subr.mxu0 %v3488_v19 }
 0x154   : > { %2487 = vmatpush3.msra.mxu1 %v3490_v22  ;;  %2446 = vmatpush3.msra.mxu0 %v2721_v5 }
 0x155   : > { %2488 = vmatprep.subr.mxu1 %v3488_v19  ;;  %2447 = vmatprep.subr.mxu0 %v3488_v19 }
 0x156   : > { %2489 = vmatpush3.msra.mxu1 %v3491_v23  ;;  %2448 = vmatpush3.msra.mxu0 %v2723_v6 }
 0x157   : > { %2490 = vmatprep.subr.mxu1 %v3488_v19  ;;  %2449 = vmatprep.subr.mxu0 %v3488_v19 }
 0x158   : > { %2491 = vmatpush3.msra.mxu1 %v3492_v27  ;;  %2450 = vmatpush3.msra.mxu0 %v2735_v10 }
 0x159   : > { %2492 = vmatprep.subr.mxu1 %v3488_v19  ;;  %2451 = vmatprep.subr.mxu0 %v3488_v19 }
 0x15a   : > { %2493 = vmatpush3.msra.mxu1 %v3493_v29  ;;  %2452 = vmatpush3.msra.mxu0 %v2737_v11 }
 0x15b   : > { %2494 = vmatprep.subr.mxu1 %v3488_v19  ;;  %2453 = vmatprep.subr.mxu0 %v3488_v19 }
 0x15c   : > { %2495 = vmatpush3.msra.mxu1 %v3494_v37  ;;  %2454 = vmatpush3.msra.mxu0 %v2739_v12 }
 0x15d   : > { %2496 = vmatprep.subr.mxu1 %v3488_v19  ;;  %2455 = vmatprep.subr.mxu0 %v3488_v19 }
 0x15e   : > { %2497 = vmatpush3.msra.mxu1 %v3495_v38  ;;  %2456 = vmatpush3.msra.mxu0 %v2758_v17 }
 0x15f   : > { %2498 = vmatprep.subr.mxu1 %v3488_v19  ;;  %2457 = vmatprep.subr.mxu0 %v3488_v19 }
 0x160   : > { %2499 = vmatpush3.msra.mxu1 %v2993_v60  ;;  %2458 = vmatpush3.msra.mxu0 %v2789_v25 }
 0x161   : > { %2500 = vmatprep.subr.mxu1 %v3488_v19  ;;  %2459 = vmatprep.subr.mxu0 %v3488_v19 }
 0x162   : > { %2501 = vmatpush3.msra.mxu1 %v3007_v49  ;;  %2460 = vmatpush3.msra.mxu0 %v2798_v28 }
 0x163   : > { %2502 = vmatprep.subr.mxu1 %v3488_v19  ;;  %2461 = vmatprep.subr.mxu0 %v3488_v19 }
 0x164   : > { %2503 = vmatpush3.msra.mxu1 %v3018_v56  ;;  %2462 = vmatpush3.msra.mxu0 %v2818_v35 }
 0x165   : > { %2504 = vmatprep.subr.mxu1 %v3488_v19  ;;  %2463 = vmatprep.subr.mxu0 %v3488_v19 }
 0x166   : > { %2505 = vmatpush3.msra.mxu1 %v3026_v1  ;;  %2464 = vmatpush3.msra.mxu0 %v2851_v45 }
 0x167   : > { %2506 = vmatprep.subr.mxu1 %v3488_v19  ;;  %2465 = vmatprep.subr.mxu0 %v3488_v19 }
 0x168   : > { %2507 = vmatpush3.msra.mxu1 %v3033_v14  ;;  %2466 = vmatpush3.msra.mxu0 %v2861_v48 }
 0x169   : > { %2508 = vmatprep.subr.mxu1 %v3488_v19  ;;  %2467 = vmatprep.subr.mxu0 %v3488_v19 }
 0x16a   : > { %2509 = vmatpush3.msra.mxu1 %v3039_v33  ;;  %2468 = vmatpush3.msra.mxu0 %v2894_v59 }
 0x16b   : > { %2548 = vmatprep.subr.mxu1 %v3488_v19  ;;  %2469 = vmatprep.subr.mxu0 %v3488_v19 }
 0x16c   : > { %2470 = vmatpush3.msra.mxu0 %v2907_v63  ;;  %2475 = vmatprep.mubr.msk.f32.mxu0 %vm2674_vm0, %v3488_v19 }
 0x16d   : > { %2471 = vmatprep.subr.mxu0 %v3488_v19 }
 0x16e   : > { %2472 = vmatpush3.msra.mxu0 %v2928_v13 }
 0x16f   : > { %2473 = vmatprep.subr.mxu0 %v3488_v19 }
 0x170   : > { %2474 = vmatpush3.msra.mxu0 %v2946_v32 }
 0x171   : > { %2513 = vmatprep.subr.mxu0 %v3488_v19 }
 0x201   : > { %v978_v44 = vpop.f32.mrf.mxu1 }
 0x203   : > { %v2422_v46 = vpop.f32.mrf.mxu1 }
 0x205   : > { %v1126_v53 = vpop.f32.mrf.mxu1 }
 0x207   : > { %v2432_v56 = vpop.f32.mrf.mxu1 }
 0x209   : > { %v902_v2 = vpop.f32.mrf.mxu0  ;;  %v1272_v39 = vpop.f32.mrf.mxu1 }
 0x20a   : > { %v979_v1 = vadd.f32 %v978_v44, %v902_v2 }
 0x20b   : > { %v2417_v52 = vpop.f32.mrf.mxu0  ;;  %v2442_v58 = vpop.f32.mrf.mxu1 }
 0x20d   : > { %v1052_v60 = vpop.f32.mrf.mxu0 }
 0x20e   : > { %v1053_v49 = vadd.f32 %v1052_v60, %v979_v1 }
 0x20f   : > { %v2427_v14 = vpop.f32.mrf.mxu0 }
 0x210   : > { %v1127_v33 = vadd.f32 %v1126_v53, %v1053_v49 }
 0x211   : > { %v1200_v26 = vpop.f32.mrf.mxu0 }
 0x212   : > { %v1201_v42 = vadd.f32 %v1200_v26, %v1127_v33 }
 0x213   : > { %v2437_v9 = vpop.f32.mrf.mxu0 }
 0x214   : > { %v1273_v62 = vadd.f32 %v1272_v39, %v1201_v42 }
 0x216   : > { %v1276_v36 = vsub.f32 %v3496_v0, %v1273_v62 }
 0x218   : > { %v1277_v51 = vmul.f32 %v1276_v36, %v1276_v36 }
 0x21a   : > { %v3277_v7 = vand.u32 4294901760, %v1277_v51 }
 0x21c   : > { %v3280_v57 = vsub.f32 %v1277_v51, %v3277_v7  ;;  %2511 = vmatmul.mubr.f32.vlgmr.msra.gmra.mxu1 %v3277_v7 }
 0x21d   : > { %2549 = vmatpush3.msra.mxu1 %v2719_v4  ;;  %2580 = vmatprep.mubr.msk.f32.mxu1 %vm2674_vm0, %v3488_v19 }
 0x21e   : > { %2550 = vmatprep.subr.mxu1 %v3488_v19  ;;  %v1361_v40 = vand.u32 4294901760, %v3280_v57 }
 0x21f   : > { %2551 = vmatpush3.msra.mxu1 %v2721_v5 }
 0x220   : > { %2552 = vmatprep.subr.mxu1 %v3488_v19  ;;  %v1362_v24 = vsub.f32 %v3280_v57, %v1361_v40 }
 0x221   : > { %2553 = vmatpush3.msra.mxu1 %v2723_v6 }
 0x222   : > { %2554 = vmatprep.subr.mxu1 %v3488_v19  ;;  %v1363_v3 = vand.u32 4294901760, %v1362_v24 }
 0x223   : > { %2555 = vmatpush3.msra.mxu1 %v2735_v10 }
 0x224   : > { %2556 = vmatprep.subr.mxu1 %v3488_v19  ;;  %2476 = vmatmul.mubr.f32.vlgmr.msra.gmra.mxu0 %v1363_v3 }
 0x225   : > { %2514 = vmatpush3.msra.mxu0 %v2753_v15  ;;  %2557 = vmatpush3.msra.mxu1 %v2737_v11  ;;  %v3503_v15 = vld [vmem:[#allocation8_spill] sm:$0xff] }
 0x226   : > { %2515 = vmatprep.subr.mxu0 %v3488_v19  ;;  %2558 = vmatprep.subr.mxu1 %v3488_v19 }
 0x227   : > { %2516 = vmatpush3.msra.mxu0 %v2756_v16  ;;  %2559 = vmatpush3.msra.mxu1 %v2739_v12  ;;  %v3504_v16 = vld [vmem:[#allocation11_spill] sm:$0xff] }
 0x228   : > { %2517 = vmatprep.subr.mxu0 %v3488_v19  ;;  %2560 = vmatprep.subr.mxu1 %v3488_v19 }
 0x229   : > { %2518 = vmatpush3.msra.mxu0 %v2761_v18  ;;  %2561 = vmatpush3.msra.mxu1 %v2758_v17  ;;  %v3506_v18 = vld [vmem:[#allocation15_spill] sm:$0xff] }
 0x22a   : > { %2519 = vmatprep.subr.mxu0 %v3488_v19  ;;  %2562 = vmatprep.subr.mxu1 %v3488_v19 }
 0x22b   : > { %2520 = vmatpush3.msra.mxu0 %v2774_v20  ;;  %2563 = vmatpush3.msra.mxu1 %v2789_v25  ;;  %v3507_v20 = vld [vmem:[#allocation17_spill] sm:$0xff] }
 0x22c   : > { %2521 = vmatprep.subr.mxu0 %v3488_v19  ;;  %2564 = vmatprep.subr.mxu1 %v3488_v19 }
 0x22d   : > { %2522 = vmatpush3.msra.mxu0 %v2777_v21  ;;  %2565 = vmatpush3.msra.mxu1 %v2798_v28  ;;  %v3508_v21 = vld [vmem:[#allocation19_spill] sm:$0xff] }
 0x22e   : > { %2523 = vmatprep.subr.mxu0 %v3488_v19  ;;  %2566 = vmatprep.subr.mxu1 %v3488_v19 }
 0x22f   : > { %2524 = vmatpush3.msra.mxu0 %v2804_v30  ;;  %2567 = vmatpush3.msra.mxu1 %v2818_v35  ;;  %v3511_v30 = vld [vmem:[#allocation24_spill] sm:$0xff] }
 0x230   : > { %2525 = vmatprep.subr.mxu0 %v3488_v19  ;;  %2568 = vmatprep.subr.mxu1 %v3488_v19 }
 0x231   : > { %2526 = vmatpush3.msra.mxu0 %v2815_v34  ;;  %2569 = vmatpush3.msra.mxu1 %v2851_v45  ;;  %v3512_v34 = vld [vmem:[#allocation25_spill] sm:$0xff] }
 0x232   : > { %2527 = vmatprep.subr.mxu0 %v3488_v19  ;;  %2570 = vmatprep.subr.mxu1 %v3488_v19 }
 0x233   : > { %2528 = vmatpush3.msra.mxu0 %v2845_v43  ;;  %2571 = vmatpush3.msra.mxu1 %v2861_v48 }
 0x234   : > { %2529 = vmatprep.subr.mxu0 %v3488_v19  ;;  %2572 = vmatprep.subr.mxu1 %v3488_v19 }
 0x235   : > { %2530 = vmatpush3.msra.mxu0 %v2857_v47  ;;  %2573 = vmatpush3.msra.mxu1 %v2894_v59 }
 0x236   : > { %2531 = vmatprep.subr.mxu0 %v3488_v19  ;;  %2574 = vmatprep.subr.mxu1 %v3488_v19 }
 0x237   : > { %2532 = vmatpush3.msra.mxu0 %v2881_v55  ;;  %2575 = vmatpush3.msra.mxu1 %v2907_v63 }
 0x238   : > { %2533 = vmatprep.subr.mxu0 %v3488_v19  ;;  %2576 = vmatprep.subr.mxu1 %v3488_v19 }
 0x239   : > { %2534 = vmatpush3.msra.mxu0 %v2900_v61  ;;  %2577 = vmatpush3.msra.mxu1 %v2928_v13 }
 0x23a   : > { %2535 = vmatprep.subr.mxu0 %v3488_v19  ;;  %2578 = vmatprep.subr.mxu1 %v3488_v19 }
 0x23b   : > { %2536 = vmatpush3.msra.mxu0 %v2922_v8  ;;  %2579 = vmatpush3.msra.mxu1 %v2946_v32 }
 0x23c   : > { %2537 = vmatprep.subr.mxu0 %v3488_v19  ;;  %2581 = vmatmul.mubr.f32.vlgmr.msra.gmra.mxu1 %v1361_v40 }
 0x23d   : > { %2618 = vmatprep.subr.mxu1 %v3488_v19  ;;  %2538 = vmatpush3.msra.mxu0 %v2942_v31 }
 0x23e   : > { %2619 = vmatpush3.msra.mxu1 %v2719_v4  ;;  %2539 = vmatprep.subr.mxu0 %v3488_v19  ;;  %v3497_v4 = vld [vmem:[#allocation2_spill] sm:$0xff] }
 0x23f   : > { %2620 = vmatprep.subr.mxu1 %v3488_v19  ;;  %2540 = vmatpush3.msra.mxu0 %v2958_v41 }
 0x240   : > { %2621 = vmatpush3.msra.mxu1 %v2721_v5  ;;  %2541 = vmatprep.subr.mxu0 %v3488_v19  ;;  %v3498_v5 = vld [vmem:[#allocation3_spill] sm:$0xff] }
 0x241   : > { %2622 = vmatprep.subr.mxu1 %v3488_v19  ;;  %2542 = vmatpush3.msra.mxu0 %v2973_v54 }
 0x242   : > { %2623 = vmatpush3.msra.mxu1 %v2723_v6  ;;  %2543 = vmatprep.subr.mxu0 %v3488_v19  ;;  %v3499_v6 = vld [vmem:[#allocation4_spill] sm:$0xff] }
 0x243   : > { %2624 = vmatprep.subr.mxu1 %v3488_v19  ;;  %2544 = vmatpush3.msra.mxu0 %v2987_v50 }
 0x244   : > { %2545 = vmatprep.mubr.msk.f32.mxu0 %vm2674_vm0, %v3488_v19  ;;  %2625 = vmatpush3.msra.mxu1 %v2735_v10  ;;  %v3500_v10 = vld [vmem:[#allocation5_spill] sm:$0xff] }
 0x245   : > { %2546 = vmatmul.mubr.f32.vlgmr.msra.gmra.mxu0 %v3280_v57  ;;  %2583 = vmatprep.subr.mxu0 %v3488_v19 }
 0x246   : > { %2626 = vmatprep.subr.mxu1 %v3488_v19  ;;  %2584 = vmatpush3.msra.mxu0 %v3497_v4 }
 0x247   : > { %2627 = vmatpush3.msra.mxu1 %v2737_v11  ;;  %2585 = vmatprep.subr.mxu0 %v3488_v19  ;;  %v3501_v11 = vld [vmem:[#allocation6_spill] sm:$0xff] }
 0x248   : > { %2628 = vmatprep.subr.mxu1 %v3488_v19  ;;  %2586 = vmatpush3.msra.mxu0 %v3498_v5 }
 0x249   : > { %2629 = vmatpush3.msra.mxu1 %v2739_v12  ;;  %2587 = vmatprep.subr.mxu0 %v3488_v19  ;;  %v3502_v12 = vld [vmem:[#allocation7_spill] sm:$0xff] }
 0x24a   : > { %2630 = vmatprep.subr.mxu1 %v3488_v19  ;;  %2588 = vmatpush3.msra.mxu0 %v3499_v6 }
 0x24b   : > { %2631 = vmatpush3.msra.mxu1 %v2758_v17  ;;  %2589 = vmatprep.subr.mxu0 %v3488_v19  ;;  %v3505_v17 = vld [vmem:[#allocation13_spill] sm:$0xff] }
 0x24c   : > { %2632 = vmatprep.subr.mxu1 %v3488_v19  ;;  %2590 = vmatpush3.msra.mxu0 %v3500_v10 }
 0x24d   : > { %2633 = vmatpush3.msra.mxu1 %v2789_v25  ;;  %2591 = vmatprep.subr.mxu0 %v3488_v19  ;;  %v3509_v25 = vld [vmem:[#allocation21_spill] sm:$0xff] }
 0x24e   : > { %2634 = vmatprep.subr.mxu1 %v3488_v19  ;;  %2592 = vmatpush3.msra.mxu0 %v3501_v11 }
 0x24f   : > { %2635 = vmatpush3.msra.mxu1 %v2798_v28  ;;  %2593 = vmatprep.subr.mxu0 %v3488_v19  ;;  %v3510_v28 = vld [vmem:[#allocation23_spill] sm:$0xff] }
 0x250   : > { %2636 = vmatprep.subr.mxu1 %v3488_v19  ;;  %2594 = vmatpush3.msra.mxu0 %v3502_v12 }
 0x251   : > { %2637 = vmatpush3.msra.mxu1 %v2818_v35  ;;  %2595 = vmatprep.subr.mxu0 %v3488_v19 }
 0x252   : > { %2638 = vmatprep.subr.mxu1 %v3488_v19  ;;  %2596 = vmatpush3.msra.mxu0 %v3503_v15 }
 0x253   : > { %2639 = vmatpush3.msra.mxu1 %v2851_v45  ;;  %2597 = vmatprep.subr.mxu0 %v3488_v19 }
 0x254   : > { %2640 = vmatprep.subr.mxu1 %v3488_v19  ;;  %2598 = vmatpush3.msra.mxu0 %v3504_v16 }
 0x255   : > { %2641 = vmatpush3.msra.mxu1 %v2861_v48  ;;  %2599 = vmatprep.subr.mxu0 %v3488_v19 }
 0x256   : > { %2642 = vmatprep.subr.mxu1 %v3488_v19  ;;  %2600 = vmatpush3.msra.mxu0 %v3505_v17 }
 0x257   : > { %2643 = vmatpush3.msra.mxu1 %v2894_v59  ;;  %2601 = vmatprep.subr.mxu0 %v3488_v19 }
 0x258   : > { %2644 = vmatprep.subr.mxu1 %v3488_v19  ;;  %2602 = vmatpush3.msra.mxu0 %v3506_v18 }
 0x259   : > { %2645 = vmatpush3.msra.mxu1 %v2907_v63  ;;  %2603 = vmatprep.subr.mxu0 %v3488_v19 }
 0x25a   : > { %2646 = vmatprep.subr.mxu1 %v3488_v19  ;;  %2604 = vmatpush3.msra.mxu0 %v3507_v20 }
 0x25b   : > { %2647 = vmatpush3.msra.mxu1 %v2928_v13  ;;  %2605 = vmatprep.subr.mxu0 %v3488_v19 }
 0x25c   : > { %2648 = vmatprep.subr.mxu1 %v3488_v19  ;;  %2606 = vmatpush3.msra.mxu0 %v3508_v21 }
 0x25d   : > { %2649 = vmatpush3.msra.mxu1 %v2946_v32  ;;  %2650 = vmatprep.mubr.msk.f32.mxu1 %vm2674_vm0, %v3488_v19 }
 0x25e   : > { %2607 = vmatprep.subr.mxu0 %v3488_v19  ;;  %2651 = vmatmul.mubr.f32.vlgmr.msra.gmra.mxu1 %v3277_v7 }
 0x25f   : > { %2608 = vmatpush3.msra.mxu0 %v3509_v25  ;;  %2615 = vmatprep.mubr.msk.f32.mxu0 %vm2674_vm0, %v3488_v19 }
 0x260   : > { %2609 = vmatprep.subr.mxu0 %v3488_v19 }
 0x261   : > { %2610 = vmatpush3.msra.mxu0 %v3510_v28 }
 0x262   : > { %2611 = vmatprep.subr.mxu0 %v3488_v19 }
 0x263   : > { %2612 = vmatpush3.msra.mxu0 %v3511_v30 }
 0x264   : > { %2613 = vmatprep.subr.mxu0 %v3488_v19 }
 0x265   : > { %2614 = vmatpush3.msra.mxu0 %v3512_v34 }
 0x266   : > { %2616 = vmatmul.mubr.f32.vlgmr.msra.gmra.mxu0 %v3277_v7 }
 0x2dc   : > { %v1516_v35 = vpop.f32.mrf.mxu1 }
 0x2de   : > { %v2512_v43 = vpop.f32.mrf.mxu1 }
 0x2e4   : > { %v1365_v45 = vpop.f32.mrf.mxu0 }
 0x2e5   : > { %v1517_v63 = vadd.f32 %v1516_v35, %v1365_v45 }
 0x2e6   : > { %v2477_v47 = vpop.f32.mrf.mxu0 }
 0x2fc   : > { %v1709_v48 = vpop.f32.mrf.mxu1 }
 0x2fe   : > { %v2582_v50 = vpop.f32.mrf.mxu1 }
 0x305   : > { %v1620_v55 = vpop.f32.mrf.mxu0 }
 0x306   : > { %v1621_v13 = vadd.f32 %v1620_v55, %v1517_v63 }
 0x307   : > { %v2547_v59 = vpop.f32.mrf.mxu0 }
 0x308   : > { %v1710_v31 = vadd.f32 %v1709_v48, %v1621_v13 }
 0x31e   : > { %v1915_v61 = vpop.f32.mrf.mxu1 }
 0x320   : > { %v2652_v8 = vpop.f32.mrf.mxu1 }
 0x326   : > { %v1828_v32 = vpop.f32.mrf.mxu0 }
 0x327   : > { %v1829_v41 = vadd.f32 %v1828_v32, %v1710_v31 }
 0x328   : > { %v2617_v54 = vpop.f32.mrf.mxu0 }
 0x329   : > { %v1916_v19 = vadd.f32 %v1915_v61, %v1829_v41 }
 0x32b   : > { %v1919_v22 = vmul.f32 0.06666667, %v1916_v19 }
 0x32d   : > { %v1920_v23 = vmax.f32 %v1919_v22, 1e-06 }
 0x32f   : > { %v1921_v27 = vmin.f32 %v1920_v23, 1000000.0 }
 0x331   : > { %2663 = vlog2.f32 %v1921_v27 }
 0x33e   : > { %v2664_v29 = vpop.eup %2663 }
 0x33f   : > { %v1923_v37 = vmul.f32 0.6931472, %v2664_v29 }
 0x341   : > { %1924 = vst.msk [vmem:[%s165_s30] sm:$0xff] %vm826_vm1, %v1923_v37 }
 0x342 PF: > { %s13_s12 = sadd.s32 1, %s2671_s12  }
 0x343   : > { %p10_p4 = scmp.ge.s32.totalorder %s13_s12, 4  }
 0x345   :  { %12 = sbr.rel (!%p10_p4) target bundleno = 1 (0x1), region = 62 }

</bundles_post_ra>
